<compile_context>
chip_gen: v6e
topology: v6e:2x2x1
jax: 0.10.0
libtpu: 0.0.40
codegen_flags: <defaults>
</compile_context>

<pallas_src>
import jax
import jax.numpy as jnp
from jax.experimental import pallas as pl
from jax.experimental.pallas import tpu as pltpu


def regression_kernel(x_ref, w1_ref, b1_ref, w2_ref, b2_ref, w3_ref, b3_ref,
                      o_ref):
    tb = x_ref.shape[1]
    x = x_ref[...]                                   # (6, TB) f32, lane-dense

    # --- model1: Linear(6,6) + Tanh.  K=6 -> 6 rank-1 VPU FMAs (skip MXU) ---
    w1 = w1_ref[...]                                 # (6, 6)  (out, in)
    h1 = jnp.broadcast_to(b1_ref[...], (6, tb))      # bias (6,1) -> (6,TB)
    for j in range(6):                               # static unroll
        h1 = h1 + w1[:, j:j + 1] * x[j:j + 1, :]
    h1 = jnp.tanh(h1)                                # (6, TB)   (EUP)

    # --- model2[0:2]: Linear(6,100) + Tanh.  K=6 -> VPU rank-1 updates ---
    w2 = w2_ref[...]                                 # (100, 6) (out, in)
    h2 = jnp.broadcast_to(b2_ref[...], (100, tb))    # (100, TB)
    for j in range(6):
        h2 = h2 + w2[:, j:j + 1] * h1[j:j + 1, :]
    h2 = jnp.tanh(h2)                                # (100, TB) (EUP)

    # --- model2[2]: Linear(100,6).  K=100 -> MXU is worthwhile here ---
    out = jnp.dot(w3_ref[...], h2,                   # (6,100)@(100,TB)
                  preferred_element_type=jnp.float32)
    out = out + b3_ref[...]                          # (6, TB)
    o_ref[...] = out.astype(o_ref.dtype)             # unmasked lane-dense vst


def regression_forward(x, params, *, tb=2048):
    """x: (B, 6) float32 -> (B, 6) float32 (same semantics as the nn.Module)."""
    w1, b1, w2, b2, w3, b3 = params
    B = x.shape[0]

    # Batch goes on the lane axis; tile it at `tb` lanes (multiple of 128)
    # and pad B up to a whole number of tiles.  Round B to a multiple of 128
    # rather than a power of two to minimize padded lanes for small batches.
    b_rounded = 128 * pl.cdiv(B, 128)
    tb = int(min(tb, b_rounded))
    tb = 128 * pl.cdiv(tb, 128)                      # guarantee lane multiple
    b_pad = tb * pl.cdiv(B, tb)

    xt = x.T                                         # (6, B)
    if b_pad != B:
        xt = jnp.pad(xt, ((0, 0), (0, b_pad - B)))

    grid = (b_pad // tb,)

    def resident(shape):                             # weights stay VMEM-resident
        return pl.BlockSpec(shape, lambda i: (0, 0))

    flops = 2 * b_pad * (6 * 6 + 6 * 100 + 100 * 6)
    transcendentals = b_pad * (6 + 100)
    bytes_accessed = 4 * (b_pad * (6 + 6)            # x in + out
                          + 6 * 6 + 6 + 100 * 6 + 100 + 6 * 100 + 6)  # params

    out_t = pl.pallas_call(
        regression_kernel,
        out_shape=jax.ShapeDtypeStruct((6, b_pad), jnp.float32),
        grid=grid,
        in_specs=[
            pl.BlockSpec((6, tb), lambda i: (0, i)),   # x tile (double-buffered)
            resident((6, 6)),                          # w1
            resident((6, 1)),                          # b1
            resident((100, 6)),                        # w2
            resident((100, 1)),                        # b2
            resident((6, 100)),                        # w3
            resident((6, 1)),                          # b3
        ],
        out_specs=pl.BlockSpec((6, tb), lambda i: (0, i)),
        compiler_params=pltpu.CompilerParams(
            dimension_semantics=("parallel",)),        # v7x dual-TC sharding
        cost_estimate=pl.CostEstimate(
            flops=flops,
            transcendentals=transcendentals,
            bytes_accessed=bytes_accessed),
    )(xt, w1, b1, w2, b2, w3, b3)

    return out_t[:, :B].T                             # strip pad, back to (B, 6)


def init_params(key):
    """PyTorch-default-style init: U(-1/sqrt(fan_in), 1/sqrt(fan_in)).
    Weights stored as (out, in) like nn.Linear; biases as (out, 1)."""
    def linear(key, fan_in, fan_out):
        kw, kb = jax.random.split(key)
        bound = 1.0 / jnp.sqrt(jnp.float32(fan_in))
        w = jax.random.uniform(kw, (fan_out, fan_in), jnp.float32,
                               minval=-bound, maxval=bound)
        b = jax.random.uniform(kb, (fan_out, 1), jnp.float32,
                               minval=-bound, maxval=bound)
        return w, b

    k1, k2, k3 = jax.random.split(key, 3)
    w1, b1 = linear(k1, 6, 6)      # model1:    Linear(6, 6)
    w2, b2 = linear(k2, 6, 100)    # model2[0]: Linear(6, 100)
    w3, b3 = linear(k3, 100, 6)    # model2[2]: Linear(100, 6)
    return (w1, b1, w2, b2, w3, b3)


def reference_forward(x, params):
    w1, b1, w2, b2, w3, b3 = params
    h1 = jnp.tanh(x @ w1.T + b1[:, 0])
    h2 = jnp.tanh(h1 @ w2.T + b2[:, 0])
    return h2 @ w3.T + b3[:, 0]


if __name__ == "__main__":
    key = jax.random.PRNGKey(0)
    kx, kp = jax.random.split(key)
    params = init_params(kp)

    # Small-batch smoke test (B=8): single grid step, batch padded to 128 lanes.
    B = 8
    x = jax.random.normal(kx, (B, 6), dtype=jnp.float32)
    out = jax.block_until_ready(regression_forward(x, params))
    ref = reference_forward(x, params)
    assert out.shape == (B, 6)
    assert jnp.allclose(out, ref, atol=1e-4, rtol=1e-4)

    # Exercise grid > 1 and the padding path (B=300, TB=128 -> 3 grid steps).
    B2 = 300
    x2 = jax.random.normal(kx, (B2, 6), dtype=jnp.float32)
    out2 = jax.block_until_ready(regression_forward(x2, params, tb=128))
    ref2 = reference_forward(x2, params)
    assert out2.shape == (B2, 6)
    assert jnp.allclose(out2, ref2, atol=1e-4, rtol=1e-4)

    # Larger batch through the default tile size (single 2048-lane tile).
    B3 = 2048
    x3 = jax.random.normal(kx, (B3, 6), dtype=jnp.float32)
    out3 = jax.block_until_ready(regression_forward(x3, params))
    ref3 = reference_forward(x3, params)
    assert out3.shape == (B3, 6)
    assert jnp.allclose(out3, ref3, atol=1e-4, rtol=1e-4)

    print("KERNEL_OK")
</pallas_src>

<mosaic_0001>
module attributes {stable_mosaic.version = 11 : i64} {
  func.func @regression_kernel(%arg0: i32, %arg1: memref<6x128xf32, #tpu.memory_space<vmem>>, %arg2: memref<6x6xf32, #tpu.memory_space<vmem>>, %arg3: memref<6x1xf32, #tpu.memory_space<vmem>>, %arg4: memref<100x6xf32, #tpu.memory_space<vmem>>, %arg5: memref<100x1xf32, #tpu.memory_space<vmem>>, %arg6: memref<6x100xf32, #tpu.memory_space<vmem>>, %arg7: memref<6x1xf32, #tpu.memory_space<vmem>>, %arg8: memref<6x128xf32, #tpu.memory_space<vmem>>) attributes {dimension_semantics = [#tpu.dimension_semantics<parallel>], iteration_bounds = array<i64: 1>, scalar_prefetch = 0 : i64, scratch_operands = 0 : i64, tpu.core_type = #tpu.core_type<tc>, window_params = [{transform_indices = @transform_0, window_bounds = array<i64: 6, 128>}, {pipeline_mode = #tpu.pipeline_mode<synchronous>, transform_indices = @transform_1, window_bounds = array<i64: 6, 6>}, {pipeline_mode = #tpu.pipeline_mode<synchronous>, transform_indices = @transform_2, window_bounds = array<i64: 6, 1>}, {pipeline_mode = #tpu.pipeline_mode<synchronous>, transform_indices = @transform_3, window_bounds = array<i64: 100, 6>}, {pipeline_mode = #tpu.pipeline_mode<synchronous>, transform_indices = @transform_4, window_bounds = array<i64: 100, 1>}, {pipeline_mode = #tpu.pipeline_mode<synchronous>, transform_indices = @transform_5, window_bounds = array<i64: 6, 100>}, {pipeline_mode = #tpu.pipeline_mode<synchronous>, transform_indices = @transform_6, window_bounds = array<i64: 6, 1>}, {transform_indices = @transform_7, window_bounds = array<i64: 6, 128>}]} {
    %c0 = arith.constant 0 : index
    %c0_0 = arith.constant 0 : index
    %0 = vector.load %arg1[%c0, %c0_0] : memref<6x128xf32, #tpu.memory_space<vmem>>, vector<6x128xf32>
    %c0_1 = arith.constant 0 : index
    %c0_2 = arith.constant 0 : index
    %1 = vector.load %arg2[%c0_1, %c0_2] : memref<6x6xf32, #tpu.memory_space<vmem>>, vector<6x6xf32>
    %c0_3 = arith.constant 0 : index
    %c0_4 = arith.constant 0 : index
    %2 = vector.load %arg3[%c0_3, %c0_4] : memref<6x1xf32, #tpu.memory_space<vmem>>, vector<6x1xf32>
    %3 = vector.shape_cast %2 : vector<6x1xf32> to vector<6x1xf32>
    %4 = vector.broadcast %3 : vector<6x1xf32> to vector<6x128xf32>
    %5 = vector.extract_strided_slice %1 {offsets = [0, 0], sizes = [6, 1], strides = [1, 1]} : vector<6x6xf32> to vector<6x1xf32>
    %6 = vector.extract_strided_slice %0 {offsets = [0, 0], sizes = [1, 128], strides = [1, 1]} : vector<6x128xf32> to vector<1x128xf32>
    %7 = vector.broadcast %5 : vector<6x1xf32> to vector<6x128xf32>
    %8 = vector.broadcast %6 : vector<1x128xf32> to vector<6x128xf32>
    %9 = arith.mulf %7, %8 : vector<6x128xf32>
    %10 = arith.addf %4, %9 : vector<6x128xf32>
    %11 = vector.extract_strided_slice %1 {offsets = [0, 1], sizes = [6, 1], strides = [1, 1]} : vector<6x6xf32> to vector<6x1xf32>
    %12 = vector.extract_strided_slice %0 {offsets = [1, 0], sizes = [1, 128], strides = [1, 1]} : vector<6x128xf32> to vector<1x128xf32>
    %13 = vector.broadcast %11 : vector<6x1xf32> to vector<6x128xf32>
    %14 = vector.broadcast %12 : vector<1x128xf32> to vector<6x128xf32>
    %15 = arith.mulf %13, %14 : vector<6x128xf32>
    %16 = arith.addf %10, %15 : vector<6x128xf32>
    %17 = vector.extract_strided_slice %1 {offsets = [0, 2], sizes = [6, 1], strides = [1, 1]} : vector<6x6xf32> to vector<6x1xf32>
    %18 = vector.extract_strided_slice %0 {offsets = [2, 0], sizes = [1, 128], strides = [1, 1]} : vector<6x128xf32> to vector<1x128xf32>
    %19 = vector.broadcast %17 : vector<6x1xf32> to vector<6x128xf32>
    %20 = vector.broadcast %18 : vector<1x128xf32> to vector<6x128xf32>
    %21 = arith.mulf %19, %20 : vector<6x128xf32>
    %22 = arith.addf %16, %21 : vector<6x128xf32>
    %23 = vector.extract_strided_slice %1 {offsets = [0, 3], sizes = [6, 1], strides = [1, 1]} : vector<6x6xf32> to vector<6x1xf32>
    %24 = vector.extract_strided_slice %0 {offsets = [3, 0], sizes = [1, 128], strides = [1, 1]} : vector<6x128xf32> to vector<1x128xf32>
    %25 = vector.broadcast %23 : vector<6x1xf32> to vector<6x128xf32>
    %26 = vector.broadcast %24 : vector<1x128xf32> to vector<6x128xf32>
    %27 = arith.mulf %25, %26 : vector<6x128xf32>
    %28 = arith.addf %22, %27 : vector<6x128xf32>
    %29 = vector.extract_strided_slice %1 {offsets = [0, 4], sizes = [6, 1], strides = [1, 1]} : vector<6x6xf32> to vector<6x1xf32>
    %30 = vector.extract_strided_slice %0 {offsets = [4, 0], sizes = [1, 128], strides = [1, 1]} : vector<6x128xf32> to vector<1x128xf32>
    %31 = vector.broadcast %29 : vector<6x1xf32> to vector<6x128xf32>
    %32 = vector.broadcast %30 : vector<1x128xf32> to vector<6x128xf32>
    %33 = arith.mulf %31, %32 : vector<6x128xf32>
    %34 = arith.addf %28, %33 : vector<6x128xf32>
    %35 = vector.extract_strided_slice %1 {offsets = [0, 5], sizes = [6, 1], strides = [1, 1]} : vector<6x6xf32> to vector<6x1xf32>
    %36 = vector.extract_strided_slice %0 {offsets = [5, 0], sizes = [1, 128], strides = [1, 1]} : vector<6x128xf32> to vector<1x128xf32>
    %37 = vector.broadcast %35 : vector<6x1xf32> to vector<6x128xf32>
    %38 = vector.broadcast %36 : vector<1x128xf32> to vector<6x128xf32>
    %39 = arith.mulf %37, %38 : vector<6x128xf32>
    %40 = arith.addf %34, %39 : vector<6x128xf32>
    %41 = math.tanh %40 : vector<6x128xf32>
    %c0_5 = arith.constant 0 : index
    %c0_6 = arith.constant 0 : index
    %42 = vector.load %arg4[%c0_5, %c0_6] : memref<100x6xf32, #tpu.memory_space<vmem>>, vector<100x6xf32>
    %c0_7 = arith.constant 0 : index
    %c0_8 = arith.constant 0 : index
    %43 = vector.load %arg5[%c0_7, %c0_8] : memref<100x1xf32, #tpu.memory_space<vmem>>, vector<100x1xf32>
    %44 = vector.shape_cast %43 : vector<100x1xf32> to vector<100x1xf32>
    %45 = vector.broadcast %44 : vector<100x1xf32> to vector<100x128xf32>
    %46 = vector.extract_strided_slice %42 {offsets = [0, 0], sizes = [100, 1], strides = [1, 1]} : vector<100x6xf32> to vector<100x1xf32>
    %47 = vector.extract_strided_slice %41 {offsets = [0, 0], sizes = [1, 128], strides = [1, 1]} : vector<6x128xf32> to vector<1x128xf32>
    %48 = vector.broadcast %46 : vector<100x1xf32> to vector<100x128xf32>
    %49 = vector.broadcast %47 : vector<1x128xf32> to vector<100x128xf32>
    %50 = arith.mulf %48, %49 : vector<100x128xf32>
    %51 = arith.addf %45, %50 : vector<100x128xf32>
    %52 = vector.extract_strided_slice %42 {offsets = [0, 1], sizes = [100, 1], strides = [1, 1]} : vector<100x6xf32> to vector<100x1xf32>
    %53 = vector.extract_strided_slice %41 {offsets = [1, 0], sizes = [1, 128], strides = [1, 1]} : vector<6x128xf32> to vector<1x128xf32>
    %54 = vector.broadcast %52 : vector<100x1xf32> to vector<100x128xf32>
    %55 = vector.broadcast %53 : vector<1x128xf32> to vector<100x128xf32>
    %56 = arith.mulf %54, %55 : vector<100x128xf32>
    %57 = arith.addf %51, %56 : vector<100x128xf32>
    %58 = vector.extract_strided_slice %42 {offsets = [0, 2], sizes = [100, 1], strides = [1, 1]} : vector<100x6xf32> to vector<100x1xf32>
    %59 = vector.extract_strided_slice %41 {offsets = [2, 0], sizes = [1, 128], strides = [1, 1]} : vector<6x128xf32> to vector<1x128xf32>
    %60 = vector.broadcast %58 : vector<100x1xf32> to vector<100x128xf32>
    %61 = vector.broadcast %59 : vector<1x128xf32> to vector<100x128xf32>
    %62 = arith.mulf %60, %61 : vector<100x128xf32>
    %63 = arith.addf %57, %62 : vector<100x128xf32>
    %64 = vector.extract_strided_slice %42 {offsets = [0, 3], sizes = [100, 1], strides = [1, 1]} : vector<100x6xf32> to vector<100x1xf32>
    %65 = vector.extract_strided_slice %41 {offsets = [3, 0], sizes = [1, 128], strides = [1, 1]} : vector<6x128xf32> to vector<1x128xf32>
    %66 = vector.broadcast %64 : vector<100x1xf32> to vector<100x128xf32>
    %67 = vector.broadcast %65 : vector<1x128xf32> to vector<100x128xf32>
    %68 = arith.mulf %66, %67 : vector<100x128xf32>
    %69 = arith.addf %63, %68 : vector<100x128xf32>
    %70 = vector.extract_strided_slice %42 {offsets = [0, 4], sizes = [100, 1], strides = [1, 1]} : vector<100x6xf32> to vector<100x1xf32>
    %71 = vector.extract_strided_slice %41 {offsets = [4, 0], sizes = [1, 128], strides = [1, 1]} : vector<6x128xf32> to vector<1x128xf32>
    %72 = vector.broadcast %70 : vector<100x1xf32> to vector<100x128xf32>
    %73 = vector.broadcast %71 : vector<1x128xf32> to vector<100x128xf32>
    %74 = arith.mulf %72, %73 : vector<100x128xf32>
    %75 = arith.addf %69, %74 : vector<100x128xf32>
    %76 = vector.extract_strided_slice %42 {offsets = [0, 5], sizes = [100, 1], strides = [1, 1]} : vector<100x6xf32> to vector<100x1xf32>
    %77 = vector.extract_strided_slice %41 {offsets = [5, 0], sizes = [1, 128], strides = [1, 1]} : vector<6x128xf32> to vector<1x128xf32>
    %78 = vector.broadcast %76 : vector<100x1xf32> to vector<100x128xf32>
    %79 = vector.broadcast %77 : vector<1x128xf32> to vector<100x128xf32>
    %80 = arith.mulf %78, %79 : vector<100x128xf32>
    %81 = arith.addf %75, %80 : vector<100x128xf32>
    %82 = math.tanh %81 : vector<100x128xf32>
    %c0_9 = arith.constant 0 : index
    %c0_10 = arith.constant 0 : index
    %83 = vector.load %arg6[%c0_9, %c0_10] : memref<6x100xf32, #tpu.memory_space<vmem>>, vector<6x100xf32>
    %cst = arith.constant dense<0.000000e+00> : vector<6x128xf32>
    %84 = tpu.matmul %83, %82, %cst {dimension_numbers = #tpu.dot_dimension_numbers<[1], [0], [0], [1], [0, 0, 1, 1], [], []>} : vector<6x100xf32>, vector<100x128xf32>, vector<6x128xf32> -> vector<6x128xf32>
    %c0_11 = arith.constant 0 : index
    %c0_12 = arith.constant 0 : index
    %85 = vector.load %arg7[%c0_11, %c0_12] : memref<6x1xf32, #tpu.memory_space<vmem>>, vector<6x1xf32>
    %86 = vector.broadcast %85 : vector<6x1xf32> to vector<6x128xf32>
    %87 = arith.addf %84, %86 : vector<6x128xf32>
    %c0_13 = arith.constant 0 : index
    %c0_14 = arith.constant 0 : index
    %88 = vector.load %arg8[%c0_13, %c0_14] : memref<6x128xf32, #tpu.memory_space<vmem>>, vector<6x128xf32>
    tpu.vector_store %arg8[%c0_13, %c0_14], %87 {strides = array<i32>} : memref<6x128xf32, #tpu.memory_space<vmem>>, vector<6x128xf32>,
    return
  }
  func.func @transform_0(%arg0: i32) -> (i32, i32) {
    %c0_i32 = arith.constant 0 : i32
    %c0_i32_0 = arith.constant 0 : i32
    return %c0_i32, %arg0 : i32, i32
  }
  func.func @transform_1(%arg0: i32) -> (i32, i32) {
    %c0_i32 = arith.constant 0 : i32
    %c0_i32_0 = arith.constant 0 : i32
    %c0_i32_1 = arith.constant 0 : i32
    return %c0_i32, %c0_i32_0 : i32, i32
  }
  func.func @transform_2(%arg0: i32) -> (i32, i32) {
    %c0_i32 = arith.constant 0 : i32
    %c0_i32_0 = arith.constant 0 : i32
    %c0_i32_1 = arith.constant 0 : i32
    return %c0_i32, %c0_i32_0 : i32, i32
  }
  func.func @transform_3(%arg0: i32) -> (i32, i32) {
    %c0_i32 = arith.constant 0 : i32
    %c0_i32_0 = arith.constant 0 : i32
    %c0_i32_1 = arith.constant 0 : i32
    return %c0_i32, %c0_i32_0 : i32, i32
  }
  func.func @transform_4(%arg0: i32) -> (i32, i32) {
    %c0_i32 = arith.constant 0 : i32
    %c0_i32_0 = arith.constant 0 : i32
    %c0_i32_1 = arith.constant 0 : i32
    return %c0_i32, %c0_i32_0 : i32, i32
  }
  func.func @transform_5(%arg0: i32) -> (i32, i32) {
    %c0_i32 = arith.constant 0 : i32
    %c0_i32_0 = arith.constant 0 : i32
    %c0_i32_1 = arith.constant 0 : i32
    return %c0_i32, %c0_i32_0 : i32, i32
  }
  func.func @transform_6(%arg0: i32) -> (i32, i32) {
    %c0_i32 = arith.constant 0 : i32
    %c0_i32_0 = arith.constant 0 : i32
    %c0_i32_1 = arith.constant 0 : i32
    return %c0_i32, %c0_i32_0 : i32, i32
  }
  func.func @transform_7(%arg0: i32) -> (i32, i32) {
    %c0_i32 = arith.constant 0 : i32
    %c0_i32_0 = arith.constant 0 : i32
    return %c0_i32, %arg0 : i32, i32
  }
}

</mosaic_0001>

<bundles_post_ra>
// kernel: tpu_custom_call.1
= control target key start
LH: loop header
LB: loop body
LE: loop exit
PB: predicated region body
PF: predicated region fallthrough
CT: control target
= control target key end

     0   :  { %v1542_v1 = vmov 3   ;;  %v971_v2 = vmov 1   ;;  %v972_v4 = vmov 0   ;;  %v973_v5 = vmov 2   ;;  %s1532_s0 = inlined_call_operand.vmem [shape: f32[6,128], index: 0, kind: input, shape index: {}]   ;;  %s1533_s1 = inlined_call_operand.vmem [shape: f32[6,6], index: 1, kind: input, shape index: {}]   ;;  %s1534_s2 = inlined_call_operand.vmem [shape: f32[6,1], index: 2, kind: input, shape index: {}]   ;;  %s1535_s3 = inlined_call_operand.vmem [shape: f32[100,6], index: 3, kind: input, shape index: {}]   ;;  %s1536_s4 = inlined_call_operand.vmem [shape: f32[100,1], index: 4, kind: input, shape index: {}]   ;;  %s1537_s5 = inlined_call_operand.vmem [shape: f32[6,100], index: 5, kind: input, shape index: {}]   ;;  %s1538_s6 = inlined_call_operand.vmem [shape: f32[6,1], index: 6, kind: input, shape index: {}]   ;;  %s1539_s7 = inlined_call_operand.hbm [shape: f32[6,128], index: 7, kind: output, shape index: {}]  }
   0x1   :  { %v28_v0 = vld [vmem:[%s1533_s1] sm:$0x3f]  ;;  %862 = vset.pattern.permute.xlu0 %v1542_v1  ;;  %860 = vset.pattern.permute.xlu1 %v971_v2 }
   0x2   :  { %67 = vperm.xlu0 %862, %v28_v0   ;;  %47 = vperm.xlu1 %860, %v28_v0   ;;  %v29_v3 = vld [vmem:[%s1534_s2] sm:$0x3f] }
   0x6   :  { %863 = vset.pattern.permute.xlu0 %v972_v4  ;;  %861 = vset.pattern.permute.xlu1 %v973_v5 }
   0x7   :  { %32 = vperm.xlu0 %863, %v29_v3   ;;  %57 = vperm.xlu1 %861, %v28_v0  }
   0x8   :  { %12 = vsyncpa [#allocation3], 0  ;;  %v974_v6 = vmov 4   ;;  %v110_v7 = vld [vmem:[%s1536_s4] sm:$0xff]  ;;  %v975_v8 = vmov 5   ;;  %v113_v9 = vld [vmem:[%s1536_s4 + $0x18] sm:$0xff]  ;;  %v40_v33 = vlaneseq }
   0x9   :  { %v111_v10 = vld [vmem:[%s1536_s4 + $0x8] sm:$0xff]  ;;  %v112_v12 = vld [vmem:[%s1536_s4 + $0x10] sm:$0xff]  ;;  %v117_v13 = vld [vmem:[%s1536_s4 + $0x38] sm:$0xff]  ;;  %vm717_vm0 = vcmask 1043456   ;;  %vm977_vm1 = vmmov 0   ;;  %vm713_vm2 = vcmask 818176  }
   0xa   :  { %v115_v11 = vld [vmem:[%s1536_s4 + $0x28] sm:$0xff]  ;;  %v114_v14 = vld [vmem:[%s1536_s4 + $0x20] sm:$0xff]  ;;  %v116_v16 = vld [vmem:[%s1536_s4 + $0x30] sm:$0xff]  ;;  %v1178_v34 = vshrl.u32 %v40_v33, 7  ;;  %s978_s30 = smov [#allocation2]  }
   0xb   :  { %37 = vperm.xlu0 %863, %v28_v0   ;;  %864 = vset.pattern.permute.xlu1 %v974_v6  ;;  %v119_v15 = vld [vmem:[%s1536_s4 + $0x48] sm:$0xff]  ;;  %v121_v17 = vld [vmem:[%s1536_s4 + $0x58] sm:$0xff]  ;;  %v118_v18 = vld [vmem:[%s1536_s4 + $0x40] sm:$0xff]  ;;  %s798_s8 = sshll.u32 %s978_s30, 4  ;;  %s799_s8 = int_to_ptr.vmem [resolvable:$true] %s798_s8 }
   0xc   :  { %77 = vperm.xlu1 %864, %v28_v0   ;;  %v1068_v19 = vld [vmem:[%s1535_s3] sm:$0xff]  ;;  %v120_v20 = vld [vmem:[%s1536_s4 + $0x50] sm:$0xff]  ;;  %v1077_v21 = vld [vmem:[%s1535_s3 + $0x58] sm:$0xff]  ;;  %v42_v37 = vsub.s32 0, %v1178_v34  ;;  %v52_v38 = vsub.s32 1, %v1178_v34  ;;  %v72_v42 = vsub.s32 3, %v1178_v34  ;;  %p953_p1 = scmp.lt.s32.totalorder %s799_s8, %s799_s8 }
   0xd   :  { %v122_v22 = vld [vmem:[%s1536_s4 + $0x60] sm:$0xf]  ;;  %v1086_v23 = vld [vmem:[%s1535_s3 + $0x50] sm:$0xff]  ;;  %v1104_v26 = vld [vmem:[%s1535_s3 + $0x38] sm:$0xff]  ;;  %v62_v43 = vsub.s32 2, %v1178_v34  ;;  %v82_v47 = vsub.s32 4, %v1178_v34 }
   0xe   :  { %v109_v24 = vld [vmem:[%s1535_s3 + $0x60] sm:$0xf]  ;;  %v1111_v27 = vld [vmem:[%s1535_s3 + $0x30] sm:$0xff]  ;;  %v1116_v28 = vld [vmem:[%s1535_s3 + $0x48] sm:$0xff]  ;;  %v92_v54 = vsub.s32 5, %v1178_v34  ;;  %s948_s9 = scalar_lea.vmem %s799_s8, 128 }
   0xf   :  { %125 = vperm.xlu0 %863, %v110_v7   ;;  %v1095_v25 = vld [vmem:[%s1535_s3 + $0x40] sm:$0xff]  ;;  %v1124_v29 = vld [vmem:[%s1535_s3 + $0x28] sm:$0xff]  ;;  %v1139_v31 = vld [vmem:[%s1535_s3 + $0x18] sm:$0xff]  ;;  %v1540_v7 = vmov 0.0   ;;  %p949_p0 = scmp.ne.s32.totalorder %s799_s8, %s948_s9  ;;  %p954_p2 = scmp.lt.s32.totalorder %s948_s9, %s948_s9 }
  0x10   :  { %865 = vset.pattern.permute.xlu1 %v975_v8  ;;  %v1132_v30 = vld [vmem:[%s1535_s3 + $0x20] sm:$0xff]  ;;  %v1145_v32 = vld [vmem:[%s1535_s3 + $0x10] sm:$0xff]  ;;  %822 = vmatprep.subr.mxu0 %v1540_v7 }
  0x11   :  { %87 = vperm.xlu1 %865, %v28_v0   ;;  %v27_v39 = vld [vmem:[%s1532_s0] sm:$0x3f]  ;;  %p955_p3 = por %p954_p2, %p953_p1 }
  0x12   :  { %v43_v44 = vrot.slane %v27_v39, %v42_v37  ;;  %v53_v45 = vrot.slane %v27_v39, %v52_v38  ;;  %v73_v48 = vrot.slane %v27_v39, %v72_v42  ;;  %v63_v49 = vrot.slane %v27_v39, %v62_v43 }
  0x13   :  { %140 = vperm.xlu0 %863, %v113_v9   ;;  %v83_v55 = vrot.slane %v27_v39, %v82_v47  ;;  %v93_v62 = vrot.slane %v27_v39, %v92_v54  ;;  %p956_p4 = pnand %p955_p3, %p949_p0 }
  0x15   :  { %866 = vset.pattern.permute.xlu1 %v972_v4 }
  0x16   :  { %130 = vperm.xlu1 %866, %v111_v10  }
  0x17   :  { %150 = vperm.xlu0 %863, %v115_v11  }
  0x1a   :  { %135 = vperm.xlu1 %866, %v112_v12  }
  0x1b   :  { %160 = vperm.xlu0 %863, %v117_v13  }
  0x1e   :  { %145 = vperm.xlu1 %866, %v114_v14  }
  0x1f   :  { %170 = vperm.xlu0 %863, %v119_v15   ;;  %v1230_v15 = vld [vmem:[%s1535_s3 + $0x8] sm:$0xff] }
  0x22   :  { %155 = vperm.xlu1 %866, %v116_v16  }
  0x23   :  { %180 = vperm.xlu0 %863, %v121_v17  }
  0x26   :  { %165 = vperm.xlu1 %866, %v118_v18  }
  0x27   :  { %190 = vperm.xlu0 %863, %v1068_v19  }
  0x2a   :  { %175 = vperm.xlu1 %866, %v120_v20  }
  0x2b   :  { %245 = vperm.xlu0 %863, %v1077_v21  }
  0x2e   :  { %185 = vperm.xlu1 %866, %v122_v22  }
  0x2f   :  { %240 = vperm.xlu0 %863, %v1086_v23  }
  0x32   :  { %250 = vperm.xlu1 %866, %v109_v24  }
  0x33   :  { %230 = vperm.xlu0 %863, %v1095_v25  }
  0x36   :  { %867 = vset.pattern.permute.xlu1 %v971_v2 }
  0x37   :  { %875 = vset.pattern.permute.xlu0 %v971_v2  ;;  %332 = vperm.xlu1 %867, %v109_v24  }
  0x38   :  { %316 = vperm.xlu0 %875, %v1095_v25  }
  0x3b   :  { %328 = vperm.xlu1 %867, %v1077_v21  }
  0x3c   :  { %312 = vperm.xlu0 %875, %v1104_v26  }
  0x3f   :  { %868 = vset.pattern.permute.xlu1 %v972_v4 }
  0x40   :  { %308 = vperm.xlu0 %875, %v1111_v27   ;;  %235 = vperm.xlu1 %868, %v1116_v28  }
  0x44   :  { %304 = vperm.xlu0 %875, %v1124_v29   ;;  %869 = vset.pattern.permute.xlu1 %v971_v2 }
  0x45   :  { %324 = vperm.xlu1 %869, %v1086_v23  }
  0x48   :  { %300 = vperm.xlu0 %875, %v1132_v30  }
  0x49   :  { %870 = vset.pattern.permute.xlu1 %v1542_v1 }
  0x4a   :  { %496 = vperm.xlu1 %870, %v109_v24  }
  0x4c   :  { %296 = vperm.xlu0 %875, %v1139_v31  }
  0x4e   :  { %871 = vset.pattern.permute.xlu1 %v971_v2 }
  0x4f   :  { %320 = vperm.xlu1 %871, %v1116_v28  }
  0x50   :  { %292 = vperm.xlu0 %875, %v1145_v32  }
  0x53   :  { %872 = vset.pattern.permute.xlu1 %v973_v5 }
  0x54   :  { %900 = vset.pattern.permute.xlu0 %v974_v6  ;;  %406 = vperm.xlu1 %872, %v1086_v23  }
  0x55   :  { %574 = vperm.xlu0 %900, %v1077_v21  }
  0x58   :  { %873 = vset.pattern.permute.xlu1 %v974_v6 }
  0x59   :  { %570 = vperm.xlu0 %900, %v1086_v23   ;;  %578 = vperm.xlu1 %873, %v109_v24  }
  0x5d   :  { %566 = vperm.xlu0 %900, %v1116_v28   ;;  %874 = vset.pattern.permute.xlu1 %v972_v4 }
  0x5e   :  { %225 = vperm.xlu1 %874, %v1104_v26  }
  0x61   :  { %562 = vperm.xlu0 %900, %v1095_v25  }
  0x62   :  { %876 = vset.pattern.permute.xlu1 %v973_v5 }
  0x63   :  { %402 = vperm.xlu1 %876, %v1116_v28  }
  0x65   :  { %558 = vperm.xlu0 %900, %v1104_v26  }
  0x67   :  { %877 = vset.pattern.permute.xlu1 %v1542_v1 }
  0x68   :  { %488 = vperm.xlu1 %877, %v1086_v23  }
  0x69   :  { %554 = vperm.xlu0 %900, %v1111_v27  }
  0x6c   :  { %878 = vset.pattern.permute.xlu1 %v975_v8 }
  0x6d   :  { %550 = vperm.xlu0 %900, %v1124_v29   ;;  %660 = vperm.xlu1 %878, %v109_v24  }
  0x71   :  { %903 = vset.pattern.permute.xlu0 %v1542_v1  ;;  %879 = vset.pattern.permute.xlu1 %v972_v4 }
  0x72   :  { %492 = vperm.xlu0 %903, %v1077_v21   ;;  %220 = vperm.xlu1 %879, %v1111_v27  }
  0x76   :  { %456 = vperm.xlu0 %903, %v1145_v32   ;;  %880 = vset.pattern.permute.xlu1 %v973_v5 }
  0x77   :  { %398 = vperm.xlu1 %880, %v1095_v25  }
  0x7a   :  { %910 = vset.pattern.permute.xlu0 %v973_v5 }
  0x7b   :  { %414 = vperm.xlu0 %910, %v109_v24   ;;  %881 = vset.pattern.permute.xlu1 %v1542_v1 }
  0x7c   :  { %484 = vperm.xlu1 %881, %v1116_v28  }
  0x7d   :  { %v48_v35 = vpop.permute.xlu1 %47  ;;  %v68_v36 = vpop.permute.xlu0 %67 }
  0x7e   :  { %v54_v52 = vmul.f32 %v53_v45, %v48_v35  ;;  %v74_v57 = vmul.f32 %v73_v48, %v68_v36 }
  0x7f   :  { %410 = vperm.xlu0 %910, %v1077_v21  }
  0x80   :  { %882 = vset.pattern.permute.xlu1 %v975_v8 }
  0x81   :  { %656 = vperm.xlu1 %882, %v1077_v21  }
  0x82   :  { %v33_v40 = vpop.permute.xlu0 %32  ;;  %v58_v41 = vpop.permute.xlu1 %57 }
  0x83   :  { %374 = vperm.xlu0 %910, %v1145_v32   ;;  %v64_v58 = vmul.f32 %v63_v49, %v58_v41 }
  0x85   :  { %883 = vset.pattern.permute.xlu1 %v972_v4 }
  0x86   :  { %v38_v46 = vpop.permute.xlu0 %37  ;;  %215 = vperm.xlu1 %883, %v1124_v29  }
  0x87   :  { %v44_v50 = vmul.f32 %v43_v44, %v38_v46  ;;  %366 = vperm.xlu0 %910, %v1068_v19   ;;  %v78_v51 = vpop.permute.xlu1 %77 }
  0x88   :  { %v84_v3 = vmul.f32 %v83_v55, %v78_v51 }
  0x89   :  { %v45_v53 = vadd.f32 %v44_v50, %v33_v40 }
  0x8a   :  { %v126_v56 = vpop.permute.xlu0 %125  ;;  %884 = vset.pattern.permute.xlu1 %v973_v5 }
  0x8b   :  { %v55_v59 = vadd.f32 %v54_v52, %v45_v53  ;;  %913 = vset.pattern.permute.xlu0 %v975_v8  ;;  %394 = vperm.xlu1 %884, %v1104_v26  }
  0x8c   :  { %632 = vperm.xlu0 %913, %v1124_v29   ;;  %v88_v60 = vpop.permute.xlu1 %87 }
  0x8d   :  { %v65_v61 = vadd.f32 %v64_v58, %v55_v59  ;;  %v94_v10 = vmul.f32 %v93_v62, %v88_v60 }
  0x8e   :  { %v1212_v63 = vpop.permute.xlu0 %140 }
  0x8f   :  { %v75_v0 = vadd.f32 %v74_v57, %v65_v61  ;;  %885 = vset.pattern.permute.xlu1 %v1542_v1 }
  0x90   :  { %624 = vperm.xlu0 %913, %v1139_v31   ;;  %480 = vperm.xlu1 %885, %v1095_v25  }
  0x91   :  { %v85_v9 = vadd.f32 %v84_v3, %v75_v0  ;;  %v1218_v11 = vpop.permute.xlu1 %130 }
  0x92   :  { %v1220_v12 = vpop.permute.xlu0 %150 }
  0x93   :  { %v95_v13 = vadd.f32 %v94_v10, %v85_v9 }
  0x94   :  { %620 = vperm.xlu0 %913, %v1145_v32   ;;  %886 = vset.pattern.permute.xlu1 %v975_v8 }
  0x95   :  { %920 = vtanh.f32 %v95_v13  ;;  %652 = vperm.xlu1 %886, %v1086_v23   ;;  %v1225_v14 = vpop.permute.xlu1 %135 }
  0x96   :  { %v1232_v16 = vpop.permute.xlu0 %160 }
  0x98   :  { %616 = vperm.xlu0 %913, %v1230_v15  }
  0x99   :  { %887 = vset.pattern.permute.xlu1 %v972_v4  ;;  %v1236_v17 = vpop.permute.xlu1 %145 }
  0x9a   :  { %v171_v18 = vpop.permute.xlu0 %170  ;;  %210 = vperm.xlu1 %887, %v1132_v30  }
  0x9c   :  { %919 = vset.pattern.permute.xlu0 %v972_v4 }
  0x9d   :  { %v1240_v20 = vpop.permute.xlu1 %155 }
  0x9e   :  { %v181_v21 = vpop.permute.xlu0 %180  ;;  %888 = vset.pattern.permute.xlu1 %v973_v5 }
  0x9f   :  { %390 = vperm.xlu1 %888, %v1111_v27  }
  0xa1   :  { %v166_v22 = vpop.permute.xlu1 %165 }
  0xa2   :  { %v1244_v23 = vpop.eup %920  ;;  %v191_v24 = vpop.permute.xlu0 %190 }
  0xa3   :  { %v1249_v33 = vrot.slane %v1244_v23, %v42_v37  ;;  %889 = vset.pattern.permute.xlu1 %v1542_v1 }
  0xa4   :  { %476 = vperm.xlu1 %889, %v1104_v26  }
  0xa5   :  { %v257_v35 = vmul.f32 %v1249_v33, %v191_v24  ;;  %v1254_v36 = vpop.permute.xlu1 %175 }
  0xa6   :  { %v246_v39 = vpop.permute.xlu0 %245 }
  0xa7   :  { %v1256_v40 = vadd.f32 %v257_v35, %v126_v56  ;;  %v268_v41 = vmul.f32 %v1249_v33, %v246_v39 }
  0xa8   :  { %890 = vset.pattern.permute.xlu1 %v975_v8 }
  0xa9   :  { %v1260_v44 = vadd.f32 %v268_v41, %v181_v21  ;;  %648 = vperm.xlu1 %890, %v1116_v28   ;;  %v1263_v37 = vpop.permute.xlu1 %185  ;;  %v1278_v28 = vrot.slane %v1244_v23, %v52_v38 }
  0xaa   :  { %v1265_v45 = vpop.permute.xlu0 %240 }
  0xad   :  { %891 = vset.pattern.permute.xlu1 %v972_v4  ;;  %v1268_v46 = vpop.permute.xlu1 %250 }
  0xae   :  { %v231_v48 = vpop.permute.xlu0 %230  ;;  %205 = vperm.xlu1 %891, %v1139_v31  }
  0xaf   :  { %v265_v49 = vmul.f32 %v1249_v33, %v231_v48 }
  0xb1   :  { %v278_v52 = vadd.f32 %v265_v49, %v166_v22 }
  0xb2   :  { %892 = vset.pattern.permute.xlu1 %v973_v5  ;;  %v1273_v50 = vpop.permute.xlu1 %332 }
  0xb3   :  { %v317_v51 = vpop.permute.xlu0 %316  ;;  %386 = vperm.xlu1 %892, %v1124_v29   ;;  %v351_v7 = vmul.f32 %v1278_v28, %v1273_v50 }
  0xb4   :  { %v347_v53 = vmul.f32 %v1278_v28, %v317_v51 }
  0xb6   :  { %v1282_v55 = vadd.f32 %v347_v53, %v278_v52  ;;  %v1284_v56 = vpop.permute.xlu1 %328 }
  0xb7   :  { %v313_v57 = vpop.permute.xlu0 %312  ;;  %893 = vset.pattern.permute.xlu1 %v1542_v1 }
  0xb8   :  { %472 = vperm.xlu1 %893, %v1111_v27   ;;  %v346_v48 = vmul.f32 %v1278_v28, %v313_v57 }
  0xbb   :  { %v309_v58 = vpop.permute.xlu0 %308  ;;  %v236_v59 = vpop.permute.xlu1 %235 }
  0xbc   :  { %v266_v38 = vmul.f32 %v1249_v33, %v236_v59  ;;  %894 = vset.pattern.permute.xlu1 %v975_v8 }
  0xbd   :  { %644 = vperm.xlu1 %894, %v1095_v25  }
  0xbe   :  { %v279_v60 = vadd.f32 %v266_v38, %v171_v18 }
  0xbf   :  { %v1291_v61 = vpop.permute.xlu0 %304 }
  0xc0   :  { %v1293_v62 = vpop.permute.xlu1 %324 }
  0xc1   :  { %895 = vset.pattern.permute.xlu1 %v972_v4 }
  0xc2   :  { %200 = vperm.xlu1 %895, %v1145_v32  }
  0xc3   :  { %v1297_v0 = vpop.permute.xlu0 %300 }
  0xc5   :  { %v1299_v3 = vpop.permute.xlu1 %496 }
  0xc6   :  { %896 = vset.pattern.permute.xlu1 %v973_v5 }
  0xc7   :  { %v1302_v9 = vpop.permute.xlu0 %296  ;;  %382 = vperm.xlu1 %896, %v1132_v30  }
  0xca   :  { %v321_v25 = vpop.permute.xlu1 %320 }
  0xcb   :  { %v348_v10 = vmul.f32 %v1278_v28, %v321_v25  ;;  %v1306_v13 = vpop.permute.xlu0 %292  ;;  %897 = vset.pattern.permute.xlu1 %v1542_v1 }
  0xcc   :  { %468 = vperm.xlu1 %897, %v1124_v29  }
  0xcd   :  { %v361_v18 = vadd.f32 %v348_v10, %v279_v60  ;;  %v345_v10 = vmul.f32 %v1278_v28, %v309_v58  ;;  %v1368_v58 = vrot.slane %v1244_v23, %v72_v42 }
  0xcf   :  { %v1310_v21 = vpop.permute.xlu1 %406  ;;  %v515_v42 = vmul.f32 %v1368_v58, %v1299_v3 }
  0xd0   :  { %v1312_v22 = vpop.permute.xlu0 %574  ;;  %898 = vset.pattern.permute.xlu1 %v975_v8 }
  0xd1   :  { %640 = vperm.xlu1 %898, %v1104_v26  }
  0xd4   :  { %v1316_v24 = vpop.permute.xlu0 %570  ;;  %v579_v35 = vpop.permute.xlu1 %578 }
  0xd5   :  { %899 = vset.pattern.permute.xlu1 %v972_v4 }
  0xd6   :  { %195 = vperm.xlu1 %899, %v1230_v15  }
  0xd8   :  { %v567_v39 = vpop.permute.xlu0 %566 }
  0xd9   :  { %v226_v41 = vpop.permute.xlu1 %225 }
  0xda   :  { %v264_v29 = vmul.f32 %v1249_v33, %v226_v41  ;;  %901 = vset.pattern.permute.xlu1 %v973_v5 }
  0xdb   :  { %378 = vperm.xlu1 %901, %v1139_v31  }
  0xdc   :  { %v277_v49 = vadd.f32 %v264_v29, %v1232_v16  ;;  %v1325_v26 = vpop.permute.xlu0 %562 }
  0xde   :  { %v403_v51 = vpop.permute.xlu1 %402  ;;  %v1327_v52 = vadd.f32 %v346_v48, %v277_v49  ;;  %v1355_v48 = vrot.slane %v1244_v23, %v62_v43 }
  0xdf   :  { %902 = vset.pattern.permute.xlu1 %v1542_v1 }
  0xe0   :  { %v1330_v4 = vpop.permute.xlu0 %558  ;;  %464 = vperm.xlu1 %902, %v1132_v30  }
  0xe3   :  { %v1333_v53 = vpop.permute.xlu1 %488 }
  0xe4   :  { %v1335_v59 = vpop.permute.xlu0 %554  ;;  %904 = vset.pattern.permute.xlu1 %v975_v8 }
  0xe5   :  { %636 = vperm.xlu1 %904, %v1111_v27   ;;  %v269_v27 = vmul.f32 %v1249_v33, %v1268_v46 }
  0xe7   :  { %v282_v46 = vadd.f32 %v269_v27, %v1263_v37 }
  0xe8   :  { %v1339_v16 = vpop.permute.xlu0 %550  ;;  %v661_v57 = vpop.permute.xlu1 %660 }
  0xe9   :  { %905 = vset.pattern.permute.xlu1 %v971_v2 }
  0xea   :  { %288 = vperm.xlu1 %905, %v1230_v15  }
  0xed   :  { %v493_v38 = vpop.permute.xlu0 %492  ;;  %v221_v60 = vpop.permute.xlu1 %220 }
  0xee   :  { %v263_v25 = vmul.f32 %v1249_v33, %v221_v60  ;;  %906 = vset.pattern.permute.xlu1 %v1542_v1  ;;  %v514_v34 = vmul.f32 %v1368_v58, %v493_v38  ;;  %v267_v38 = vmul.f32 %v1249_v33, %v1265_v45  ;;  %v431_v45 = vmul.f32 %v1355_v48, %v1310_v21 }
  0xef   :  { %460 = vperm.xlu1 %906, %v1139_v31  }
  0xf0   :  { %v276_v41 = vadd.f32 %v263_v25, %v1240_v20  ;;  %v430_v20 = vmul.f32 %v1355_v48, %v403_v51  ;;  %v364_v25 = vadd.f32 %v351_v7, %v282_v46  ;;  %v1376_v51 = vrot.slane %v1244_v23, %v82_v47 }
  0xf1   :  { %v1350_v29 = vpop.permute.xlu0 %456 }
  0xf2   :  { %v399_v49 = vpop.permute.xlu1 %398  ;;  %v1357_v60 = vadd.f32 %v345_v10, %v276_v41  ;;  %v350_v10 = vmul.f32 %v1278_v28, %v1284_v56  ;;  %v443_v1 = vadd.f32 %v430_v20, %v361_v18  ;;  %v1386_v56 = vrot.slane %v1244_v23, %v92_v54 }
  0xf3   :  { %907 = vset.pattern.permute.xlu1 %v974_v6  ;;  %v594_v27 = vmul.f32 %v1376_v51, %v567_v39  ;;  %v597_v20 = vmul.f32 %v1376_v51, %v579_v35 }
  0xf4   :  { %546 = vperm.xlu1 %907, %v1132_v30   ;;  %v363_v18 = vadd.f32 %v350_v10, %v1260_v44 }
  0xf6   :  { %v415_v43 = vpop.permute.xlu0 %414 }
  0xf7   :  { %v433_v50 = vmul.f32 %v1355_v48, %v415_v43  ;;  %v485_v41 = vpop.permute.xlu1 %484 }
  0xf8   :  { %v512_v37 = vmul.f32 %v1368_v58, %v485_v41  ;;  %908 = vset.pattern.permute.xlu1 %v971_v2 }
  0xf9   :  { %v446_v7 = vadd.f32 %v433_v50, %v364_v25  ;;  %284 = vperm.xlu1 %908, %v1068_v19   ;;  %v679_v50 = vmul.f32 %v1386_v56, %v661_v57 }
  0xfa   :  { %v525_v47 = vadd.f32 %v512_v37, %v443_v1  ;;  %v411_v46 = vpop.permute.xlu0 %410  ;;  %v596_v1 = vmul.f32 %v1376_v51, %v1312_v22  ;;  %v344_v22 = vmul.f32 %v1278_v28, %v1291_v61 }
  0xfb   :  { %v528_v2 = vadd.f32 %v515_v42, %v446_v7  ;;  %v432_v43 = vmul.f32 %v1355_v48, %v411_v46  ;;  %v349_v42 = vmul.f32 %v1278_v28, %v1293_v62 }
  0xfc   :  { %v657_v3 = vpop.permute.xlu1 %656  ;;  %v1392_v25 = vadd.f32 %v594_v27, %v525_v47  ;;  %v280_v47 = vadd.f32 %v267_v38, %v1254_v36  ;;  %v1544_v36 = vmov 3  }
  0xfd   :  { %v610_v54 = vadd.f32 %v597_v20, %v528_v2  ;;  %v445_v23 = vadd.f32 %v432_v43, %v363_v18  ;;  %909 = vset.pattern.permute.xlu1 %v973_v5  ;;  %v678_v10 = vmul.f32 %v1386_v56, %v657_v3  ;;  %v1545_v3 = vmov 0.0  }
  0xfe   :  { %370 = vperm.xlu1 %909, %v1230_v15   ;;  %v362_v61 = vadd.f32 %v349_v42, %v280_v47  ;;  %848 = vmatprep.mubr.msk.f32.mxu0 %vm977_vm1, %v1545_v3 }
  0xff   :  { %v692_v44 = vadd.f32 %v679_v50, %v610_v54  ;;  %v527_v35 = vadd.f32 %v514_v34, %v445_v23 }
 0x100   :  { %v444_v62 = vadd.f32 %v431_v45, %v362_v61 }
 0x101   :  { %922 = vtanh.f32 %v692_v44  ;;  %v609_v39 = vadd.f32 %v596_v1, %v527_v35  ;;  %v216_v41 = vpop.permute.xlu1 %215  ;;  %v343_v1 = vmul.f32 %v1278_v28, %v1297_v0 }
 0x102   :  { %v262_v57 = vmul.f32 %v1249_v33, %v216_v41  ;;  %911 = vset.pattern.permute.xlu1 %v974_v6 }
 0x103   :  { %v691_v5 = vadd.f32 %v678_v10, %v609_v39  ;;  %542 = vperm.xlu1 %911, %v1139_v31   ;;  %v429_v31 = vmul.f32 %v1355_v48, %v399_v49 }
 0x104   :  { %v275_v37 = vadd.f32 %v262_v57, %v1220_v12  ;;  %v513_v12 = vmul.f32 %v1368_v58, %v1333_v53  ;;  %v595_v53 = vmul.f32 %v1376_v51, %v1316_v24 }
 0x105   :  { %924 = vtanh.f32 %v691_v5  ;;  %v442_v18 = vadd.f32 %v429_v31, %v1282_v55 }
 0x106   :  { %v395_v7 = vpop.permute.xlu1 %394  ;;  %v1411_v27 = vadd.f32 %v344_v22, %v275_v37  ;;  %v526_v21 = vadd.f32 %v513_v12, %v444_v62 }
 0x107   :  { %912 = vset.pattern.permute.xlu1 %v975_v8 }
 0x108   :  { %628 = vperm.xlu1 %912, %v1132_v30   ;;  %v593_v30 = vmul.f32 %v1376_v51, %v1325_v26  ;;  %v608_v50 = vadd.f32 %v595_v53, %v526_v21  ;;  %v341_v21 = vmul.f32 %v1278_v28, %v1306_v13  ;;  %v505_v53 = vmul.f32 %v1368_v58, %v1350_v29 }
 0x10b   :  { %v481_v46 = vpop.permute.xlu1 %480 }
 0x10c   :  { %v511_v20 = vmul.f32 %v1368_v58, %v481_v46  ;;  %914 = vset.pattern.permute.xlu1 %v1544_v36 }
 0x10d   :  { %452 = vperm.xlu1 %914, %v1230_v15  }
 0x10e   :  { %v923_v2 = vpop.eup %922  ;;  %v524_v49 = vadd.f32 %v511_v20, %v442_v18 }
 0x10f   :  { %823 = vmatpush3.msk.msra.mxu0 %vm717_vm0, %v923_v2 }
 0x110   :  { %v653_v43 = vpop.permute.xlu1 %652  ;;  %824 = vmatprep.subr.mxu0 %v1545_v3  ;;  %v606_v55 = vadd.f32 %v593_v30, %v524_v49 }
 0x111   :  { %v677_v34 = vmul.f32 %v1386_v56, %v653_v43  ;;  %915 = vset.pattern.permute.xlu1 %v974_v6 }
 0x112   :  { %v925_v54 = vpop.eup %924  ;;  %538 = vperm.xlu1 %915, %v1145_v32   ;;  %v428_v32 = vmul.f32 %v1355_v48, %v395_v7 }
 0x113   :  { %v690_v23 = vadd.f32 %v677_v34, %v608_v50  ;;  %825 = vmatpush3.msra.mxu0 %v925_v54 }
 0x114   :  { %826 = vmatprep.subr.mxu0 %v1545_v3  ;;  %v441_v41 = vadd.f32 %v428_v32, %v1327_v52 }
 0x115   :  { %926 = vtanh.f32 %v690_v23  ;;  %v211_v26 = vpop.permute.xlu1 %210 }
 0x116   :  { %v261_v24 = vmul.f32 %v1249_v33, %v211_v26  ;;  %916 = vset.pattern.permute.xlu1 %v1544_v36  ;;  %v375_v36 = vpop.permute.xlu0 %374 }
 0x117   :  { %448 = vperm.xlu1 %916, %v1068_v19  }
 0x118   :  { %v274_v44 = vadd.f32 %v261_v24, %v1236_v17  ;;  %v592_v17 = vmul.f32 %v1376_v51, %v1330_v4  ;;  %v342_v4 = vmul.f32 %v1278_v28, %v1302_v9 }
 0x11a   :  { %v391_v35 = vpop.permute.xlu1 %390  ;;  %v1440_v39 = vadd.f32 %v343_v1, %v274_v44 }
 0x11b   :  { %917 = vset.pattern.permute.xlu1 %v974_v6  ;;  %v427_v47 = vmul.f32 %v1355_v48, %v391_v35 }
 0x11c   :  { %534 = vperm.xlu1 %917, %v1230_v15  }
 0x11d   :  { %v440_v31 = vadd.f32 %v427_v47, %v1357_v60 }
 0x11f   :  { %v477_v10 = vpop.permute.xlu1 %476 }
 0x120   :  { %v510_v57 = vmul.f32 %v1368_v58, %v477_v10  ;;  %530 = vperm.xlu1 %917, %v1068_v19   ;;  %v1488_v10 = vpop.permute.xlu0 %366 }
 0x122   :  { %v927_v38 = vpop.eup %926  ;;  %v523_v0 = vadd.f32 %v510_v57, %v441_v41 }
 0x123   :  { %827 = vmatpush3.msra.mxu0 %v927_v38 }
 0x124   :  { %918 = vset.pattern.permute.xlu1 %v975_v8  ;;  %v649_v6 = vpop.permute.xlu1 %648  ;;  %828 = vmatprep.subr.mxu0 %v1545_v3  ;;  %v605_v5 = vadd.f32 %v592_v17, %v523_v0  ;;  %v633_v57 = vpop.permute.xlu0 %632 }
 0x125   :  { %v676_v15 = vmul.f32 %v1386_v56, %v649_v6  ;;  %612 = vperm.xlu1 %918, %v1068_v19  }
 0x127   :  { %v689_v52 = vadd.f32 %v676_v15, %v1392_v25  ;;  %v707_v25 = vld [vmem:[%s1538_s6] sm:$0x3f] }
 0x128   :  { %710 = vperm.xlu0 %919, %v707_v25  }
 0x129   :  { %928 = vtanh.f32 %v689_v52  ;;  %v206_v22 = vpop.permute.xlu1 %205 }
 0x12a   :  { %v260_v37 = vmul.f32 %v1249_v33, %v206_v22 }
 0x12c   :  { %v273_v42 = vadd.f32 %v260_v37, %v1212_v63  ;;  %v591_v63 = vmul.f32 %v1376_v51, %v1335_v59  ;;  %v423_v59 = vmul.f32 %v1355_v48, %v375_v36 }
 0x12e   :  { %v387_v8 = vpop.permute.xlu1 %386  ;;  %v1459_v7 = vadd.f32 %v342_v4, %v273_v42 }
 0x12f   :  { %v426_v43 = vmul.f32 %v1355_v48, %v387_v8 }
 0x131   :  { %v439_v54 = vadd.f32 %v426_v43, %v1411_v27 }
 0x133   :  { %v473_v45 = vpop.permute.xlu1 %472 }
 0x134   :  { %v509_v19 = vmul.f32 %v1368_v58, %v473_v45 }
 0x136   :  { %v929_v9 = vpop.eup %928  ;;  %v522_v61 = vadd.f32 %v509_v19, %v440_v31 }
 0x137   :  { %829 = vmatpush3.msra.mxu0 %v929_v9 }
 0x138   :  { %v645_v12 = vpop.permute.xlu1 %644  ;;  %830 = vmatprep.subr.mxu0 %v1545_v3  ;;  %v604_v60 = vadd.f32 %v591_v63, %v522_v61 }
 0x139   :  { %v675_v62 = vmul.f32 %v1386_v56, %v645_v12 }
 0x13b   :  { %v688_v46 = vadd.f32 %v675_v62, %v606_v55 }
 0x13d   :  { %930 = vtanh.f32 %v688_v46  ;;  %v201_v18 = vpop.permute.xlu1 %200 }
 0x13e   :  { %v259_v20 = vmul.f32 %v1249_v33, %v201_v18 }
 0x140   :  { %v272_v2 = vadd.f32 %v259_v20, %v1225_v14  ;;  %v590_v14 = vmul.f32 %v1376_v51, %v1339_v16  ;;  %v672_v16 = vmul.f32 %v1386_v56, %v633_v57 }
 0x142   :  { %v354_v30 = vadd.f32 %v341_v21, %v272_v2  ;;  %v383_v49 = vpop.permute.xlu1 %382 }
 0x143   :  { %v425_v47 = vmul.f32 %v1355_v48, %v383_v49 }
 0x144   :  { %v436_v55 = vadd.f32 %v423_v59, %v354_v30 }
 0x145   :  { %v438_v63 = vadd.f32 %v425_v47, %v1440_v39 }
 0x146   :  { %v1480_v50 = vadd.f32 %v505_v53, %v436_v55 }
 0x147   :  { %v469_v34 = vpop.permute.xlu1 %468 }
 0x148   :  { %v508_v23 = vmul.f32 %v1368_v58, %v469_v34 }
 0x14a   :  { %v931_v13 = vpop.eup %930  ;;  %v521_v26 = vadd.f32 %v508_v23, %v439_v54 }
 0x14b   :  { %831 = vmatpush3.msra.mxu0 %v931_v13 }
 0x14c   :  { %v603_v24 = vadd.f32 %v590_v14, %v521_v26  ;;  %v641_v1 = vpop.permute.xlu1 %640  ;;  %832 = vmatprep.subr.mxu0 %v1545_v3 }
 0x14d   :  { %v674_v29 = vmul.f32 %v1386_v56, %v641_v1 }
 0x14e   :  { %v685_v0 = vadd.f32 %v672_v16, %v603_v24 }
 0x14f   :  { %v687_v44 = vadd.f32 %v674_v29, %v605_v5 }
 0x151   :  { %932 = vtanh.f32 %v687_v44  ;;  %v196_v35 = vpop.permute.xlu1 %195 }
 0x152   :  { %v258_v39 = vmul.f32 %v1249_v33, %v196_v35 }
 0x154   :  { %v271_v54 = vadd.f32 %v258_v39, %v1218_v11 }
 0x156   :  { %v379_v32 = vpop.permute.xlu1 %378 }
 0x157   :  { %v424_v8 = vmul.f32 %v1355_v48, %v379_v32 }
 0x159   :  { %v437_v31 = vadd.f32 %v424_v8, %v1459_v7 }
 0x15b   :  { %v465_v27 = vpop.permute.xlu1 %464 }
 0x15c   :  { %v507_v19 = vmul.f32 %v1368_v58, %v465_v27 }
 0x15e   :  { %v933_v41 = vpop.eup %932  ;;  %v520_v62 = vadd.f32 %v507_v19, %v438_v63 }
 0x15f   :  { %833 = vmatpush3.msra.mxu0 %v933_v41 }
 0x160   :  { %v637_v38 = vpop.permute.xlu1 %636  ;;  %834 = vmatprep.subr.mxu0 %v1545_v3 }
 0x161   :  { %v673_v17 = vmul.f32 %v1386_v56, %v637_v38 }
 0x163   :  { %v686_v6 = vadd.f32 %v673_v17, %v604_v60  ;;  %v625_v60 = vpop.permute.xlu0 %624 }
 0x164   :  { %v670_v20 = vmul.f32 %v1386_v56, %v625_v60 }
 0x165   :  { %934 = vtanh.f32 %v686_v6  ;;  %v289_v5 = vpop.permute.xlu1 %288 }
 0x166   :  { %936 = vtanh.f32 %v685_v0  ;;  %v340_v55 = vmul.f32 %v1278_v28, %v289_v5 }
 0x167   :  { %v621_v30 = vpop.permute.xlu0 %620 }
 0x168   :  { %v669_v43 = vmul.f32 %v1386_v56, %v621_v30  ;;  %v353_v26 = vadd.f32 %v340_v55, %v271_v54 }
 0x16a   :  { %v461_v15 = vpop.permute.xlu1 %460 }
 0x16b   :  { %v506_v45 = vmul.f32 %v1368_v58, %v461_v15  ;;  %v617_v35 = vpop.permute.xlu0 %616 }
 0x16c   :  { %v668_v41 = vmul.f32 %v1386_v56, %v617_v35 }
 0x16d   :  { %v519_v61 = vadd.f32 %v506_v45, %v437_v31 }
 0x16f   :  { %v547_v52 = vpop.permute.xlu1 %546 }
 0x170   :  { %v589_v12 = vmul.f32 %v1376_v51, %v547_v52 }
 0x172   :  { %v935_v22 = vpop.eup %934  ;;  %v602_v36 = vadd.f32 %v589_v12, %v520_v62 }
 0x173   :  { %835 = vmatpush3.msra.mxu0 %v935_v22  ;;  %v937_v37 = vpop.eup %936 }
 0x174   :  { %v285_v4 = vpop.permute.xlu1 %284  ;;  %836 = vmatprep.subr.mxu0 %v1545_v3 }
 0x175   :  { %837 = vmatpush3.msra.mxu0 %v937_v37  ;;  %v339_v33 = vmul.f32 %v1278_v28, %v285_v4  ;;  %v421_v28 = vmul.f32 %v1355_v48, %v1488_v10 }
 0x176   :  { %838 = vmatprep.subr.mxu0 %v1545_v3 }
 0x177   :  { %v352_v27 = vadd.f32 %v339_v33, %v1256_v40 }
 0x179   :  { %v371_v42 = vpop.permute.xlu1 %370  ;;  %v434_v0 = vadd.f32 %v421_v28, %v352_v27 }
 0x17a   :  { %v422_v23 = vmul.f32 %v1355_v48, %v371_v42 }
 0x17c   :  { %v435_v29 = vadd.f32 %v422_v23, %v353_v26 }
 0x17e   :  { %v543_v25 = vpop.permute.xlu1 %542 }
 0x17f   :  { %v588_v9 = vmul.f32 %v1376_v51, %v543_v25 }
 0x181   :  { %v601_v46 = vadd.f32 %v588_v9, %v519_v61 }
 0x183   :  { %v629_v18 = vpop.permute.xlu1 %628  ;;  %v683_v7 = vadd.f32 %v670_v20, %v601_v46 }
 0x184   :  { %v671_v21 = vmul.f32 %v1386_v56, %v629_v18 }
 0x186   :  { %v684_v2 = vadd.f32 %v671_v21, %v602_v36 }
 0x188   :  { %938 = vtanh.f32 %v684_v2  ;;  %v453_v59 = vpop.permute.xlu1 %452 }
 0x189   :  { %940 = vtanh.f32 %v683_v7  ;;  %v504_v24 = vmul.f32 %v1368_v58, %v453_v59 }
 0x18d   :  { %v539_v49 = vpop.permute.xlu1 %538 }
 0x18e   :  { %v587_v53 = vmul.f32 %v1376_v51, %v539_v49 }
 0x190   :  { %v600_v34 = vadd.f32 %v587_v53, %v1480_v50  ;;  %v517_v50 = vadd.f32 %v504_v24, %v435_v29 }
 0x192   :  { %v682_v13 = vadd.f32 %v669_v43, %v600_v34  ;;  %v449_v14 = vpop.permute.xlu1 %448 }
 0x193   :  { %v503_v38 = vmul.f32 %v1368_v58, %v449_v14  ;;  %v706_v58 = vld [vmem:[%s1537_s5] sm:$0x3f] }
 0x194   :  { %942 = vtanh.f32 %v682_v13 }
 0x195   :  { %v939_v1 = vpop.eup %938  ;;  %v516_v5 = vadd.f32 %v503_v38, %v434_v0 }
 0x196   :  { %839 = vmatpush3.msra.mxu0 %v939_v1  ;;  %v941_v44 = vpop.eup %940 }
 0x197   :  { %v535_v32 = vpop.permute.xlu1 %534  ;;  %840 = vmatprep.subr.mxu0 %v1545_v3 }
 0x198   :  { %v586_v11 = vmul.f32 %v1376_v51, %v535_v32  ;;  %841 = vmatpush3.msra.mxu0 %v941_v44 }
 0x199   :  { %842 = vmatprep.subr.mxu0 %v1545_v3 }
 0x19a   :  { %v599_v57 = vadd.f32 %v586_v11, %v517_v50 }
 0x19b   :  { %v531_v16 = vpop.permute.xlu1 %530 }
 0x19c   :  { %v681_v17 = vadd.f32 %v668_v41, %v599_v57  ;;  %v585_v6 = vmul.f32 %v1376_v51, %v531_v16 }
 0x19e   :  { %944 = vtanh.f32 %v681_v17  ;;  %v598_v40 = vadd.f32 %v585_v6, %v516_v5 }
 0x1a0   :  { %v613_v15 = vpop.permute.xlu1 %612 }
 0x1a1   :  { %v943_v52 = vpop.eup %942  ;;  %v667_v22 = vmul.f32 %v1386_v56, %v613_v15 }
 0x1a2   :  { %843 = vmatpush3.msra.mxu0 %v943_v52 }
 0x1a3   :  { %v680_v37 = vadd.f32 %v667_v22, %v598_v40  ;;  %844 = vmatprep.subr.mxu0 %v1545_v3  ;;  %v711_v10 = vpop.permute.xlu0 %710 }
 0x1a5   :  { %946 = vtanh.f32 %v680_v37 }
 0x1ab   :  { %v945_v48 = vpop.eup %944 }
 0x1ac   :  { %845 = vmatpush3.msra.mxu0 %v945_v48 }
 0x1ad   :  { %846 = vmatprep.subr.mxu0 %v1545_v3 }
 0x1b2   :  { %v947_v51 = vpop.eup %946 }
 0x1b3   :  { %847 = vmatpush3.msra.mxu0 %v947_v51 }
 0x1b4   :  { %849 = vmatmul.mubr.msk.f32.vlgmr.msra.gmra.mxu0 %vm713_vm2, %v706_v58 }
 0x274   :  { %v787_v56 = vpop.f32.mrf.mxu0 }
 0x275   :  { %v788_v4 = vadd.f32 %v787_v56, %v711_v10 }
 0x276   :  { %v850_v42 = vpop.f32.mrf.mxu0 }
 0x277   :  { %791 = vst [vmem:[#allocation2] sm:$0x3f] %v788_v4 }
 0x278   :  { %959 = shalt.err (!%p956_p4)
}
 0x279   :  { %801 = dma.vmem_to_hbm [thread:$0]  %s799_s8, 128, %s1539_s7, [#allocation3]  }
 0x27a   :  { %968 = dma.done.wait [#allocation3], 128  }
 0x27b   :  { %969 = vsyncadd [#allocation3], 4294967168 }
 0x27c   :  { %805 = vsyncpa [#allocation3], 1 }

</bundles_post_ra>
